<compile_context>
chip_gen: v5e
topology: v5e:2x2
jax: 0.10.0
libtpu: 0.0.40
codegen_flags: <defaults>
</compile_context>

<pallas_src>
import functools
import math

import jax
import jax.numpy as jnp
from jax import lax
from jax.experimental import pallas as pl
from jax.experimental.pallas import tpu as pltpu


def _round_up(x, m):
    return (x + m - 1) // m * m


def _rnn_kernel(xp_ref, wh_ref, out_ref, h_ref, *,
                activation: str, t_chunk: int, n_chains: int,
                rows_per_chain: int, unroll: int):
    """Grid = (batch_blocks, time_chunks).

    NOTE: the time axis must stay the LAST (innermost) grid dimension. The hidden
    state scratch is zeroed when program_id(1) == 0 and carried across consecutive
    time chunks of the same batch block; reordering the grid would leak state
    across batch blocks.
    """
    tc = pl.program_id(1)

    @pl.when(tc == 0)
    def _():
        # fresh sequence for this batch block: initial hidden state = zeros
        h_ref[...] = jnp.zeros_like(h_ref)

    wh = wh_ref[...]                       # (Hp, Hp) bf16 — resident, loaded once

    if activation == "tanh":
        act = jnp.tanh
    elif activation == "relu":
        act = lambda z: jnp.maximum(z, 0.0)
    else:
        raise ValueError(f"unknown activation: {activation}")

    # Independent recurrence chains over disjoint batch rows. Kept as separate
    # arrays (not one batched op) so the scheduler can overlap chain k's MXU
    # matmul with chain j's EUP activation — hides the serial dot->tanh latency.
    h0 = tuple(
        h_ref[nb * rows_per_chain:(nb + 1) * rows_per_chain, :]
        for nb in range(n_chains))

    def step(i, hs):
        pre = []
        for nb in range(n_chains):
            r0 = nb * rows_per_chain
            # bf16 operands into the MXU, f32 accumulation
            rec = jnp.dot(hs[nb].astype(wh.dtype), wh,
                          preferred_element_type=jnp.float32)
            pre.append(
                xp_ref[i, r0:r0 + rows_per_chain, :].astype(jnp.float32) + rec)
        new_hs = []
        for nb in range(n_chains):
            r0 = nb * rows_per_chain
            h_new = act(pre[nb])                     # f32 activation path
            out_ref[i, r0:r0 + rows_per_chain, :] = h_new.astype(out_ref.dtype)
            new_hs.append(h_new)                     # f32 carry
        return tuple(new_hs)

    hs_final = lax.fori_loop(0, t_chunk, step, h0, unroll=unroll)
    for nb in range(n_chains):
        h_ref[nb * rows_per_chain:(nb + 1) * rows_per_chain, :] = hs_final[nb]


def rnn_forward(embeds, w1, b1, wh, bh, *, activation: str = "tanh",
                t_chunk_cap: int = 32,
                mxu_dtype=jnp.bfloat16,
                xproj_dtype=jnp.bfloat16,
                block_vmem_budget: int = 24 << 20):
    """
    embeds: (batch, seq, embedding_dim)  -- PyTorch layout
    w1:     (hidden, embedding_dim)      b1: (hidden,)
    wh:     (hidden, hidden)             bh: (hidden,)
    returns: (seq, batch, hidden); out[t] == PyTorch outputs[t]
    """
    B, S, E = embeds.shape
    H = w1.shape[0]
    out_dtype = embeds.dtype

    # ---- hoisted input projection: one big GEMM, biases folded in, bf16 in HBM ----
    xproj = jnp.einsum("bse,he->sbh", embeds, w1,
                       preferred_element_type=jnp.float32)
    xproj = (xproj + (b1 + bh).astype(jnp.float32)).astype(xproj_dtype)   # (S,B,H)

    # ---- pad to TPU-friendly tiles ------------------------------------------------
    lane = 256 if H >= 256 else 128          # v6e/v7x MXU is 2x256^2 for real H
    Hp = _round_up(H, lane)

    sub = 16 if jnp.dtype(mxu_dtype).itemsize == 2 else 8   # bf16 packs 2 rows/sublane
    Bp8 = _round_up(B, sub)
    n_chains = 2                                            # interleaved recurrences
    rows_per_chain = min(128, max(sub, _round_up(-(-Bp8 // n_chains), sub)))
    TB = n_chains * rows_per_chain                          # batch rows per grid step
    Bp = _round_up(Bp8, TB)

    # ---- time chunking sized against an explicit VMEM budget -----------------------
    # xproj and out blocks are double-buffered by the pipeline.
    xb = jnp.dtype(xproj_dtype).itemsize
    ob = jnp.dtype(out_dtype).itemsize
    per_t = 2 * TB * Hp * (xb + ob)
    tck = int(min(S, t_chunk_cap, max(1, block_vmem_budget // per_t)))
    for d in range(tck, max(1, tck // 2) - 1, -1):   # prefer a chunk that divides S
        if S % d == 0:
            tck = d
            break
    Sp = _round_up(S, tck)

    xproj = jnp.pad(xproj, ((0, Sp - S), (0, Bp - B), (0, Hp - H)))
    # Wh^T, zero-padded, bf16 (MXU-native; halves its VMEM footprint).
    wh_t = jnp.pad(jnp.transpose(wh, (1, 0)),
                   ((0, Hp - H), (0, Hp - H))).astype(mxu_dtype)           # (Hp, Hp)

    wh_bytes = Hp * Hp * jnp.dtype(mxu_dtype).itemsize
    carry_bytes = TB * Hp * 4
    vmem_limit = int(min(max(32 << 20,
                             tck * per_t + wh_bytes + carry_bytes + (4 << 20)),
                         64 << 20))

    kernel = functools.partial(
        _rnn_kernel, activation=activation, t_chunk=tck,
        n_chains=n_chains, rows_per_chain=rows_per_chain,
        unroll=min(tck, 8))

    out = pl.pallas_call(
        kernel,
        out_shape=jax.ShapeDtypeStruct((Sp, Bp, Hp), out_dtype),
        grid_spec=pltpu.PrefetchScalarGridSpec(
            num_scalar_prefetch=0,
            grid=(Bp // TB, Sp // tck),              # (batch blocks, time chunks)
            in_specs=[
                # streamed input projection: one (tck, TB, Hp) block per grid step
                pl.BlockSpec((tck, TB, Hp), lambda bb, tc: (tc, bb, 0)),
                # recurrent weight: whole array resident in VMEM (loaded once,
                # single-buffered — no 2x pipeline copies of a constant operand)
                pl.BlockSpec(memory_space=pltpu.MemorySpace.VMEM),
            ],
            out_specs=pl.BlockSpec((tck, TB, Hp), lambda bb, tc: (tc, bb, 0)),
            scratch_shapes=[pltpu.VMEM((TB, Hp), jnp.float32)],  # f32 hidden carry
        ),
        compiler_params=pltpu.CompilerParams(
            # batch blocks are independent -> "parallel" (megacore / v7x 2nd TC);
            # time carries the recurrence -> MUST stay "arbitrary" AND last.
            dimension_semantics=("parallel", "arbitrary"),
            vmem_limit_bytes=vmem_limit,
        ),
    )(xproj, wh_t)

    # strip padding; out[t] matches the t-th element of the PyTorch output list
    return out[:S, :B, :H]


# ----------------------------- references (for the self-test) -----------------------
def _reference_rnn_f32(embeds, w1, b1, wh, bh, activation="tanh"):
    """Pure-f32 PyTorch-semantics reference."""
    B, S, _ = embeds.shape
    H = w1.shape[0]
    act = jnp.tanh if activation == "tanh" else (lambda z: jnp.maximum(z, 0.0))
    h = jnp.zeros((B, H), jnp.float32)
    outs = []
    for t in range(S):
        x = embeds[:, t, :].astype(jnp.float32)
        h = act(x @ w1.T + b1 + h @ wh.T + bh)
        outs.append(h)
    return jnp.stack(outs)


def _reference_rnn_bf16_matched(embeds, w1, b1, wh, bh, activation="tanh"):
    """Same numerics as the kernel's fast path (bf16 xproj storage + bf16 MXU
    operands, f32 accumulation / carry) -> allows a tight correctness check."""
    B, S, _ = embeds.shape
    H = w1.shape[0]
    act = jnp.tanh if activation == "tanh" else (lambda z: jnp.maximum(z, 0.0))
    xproj = jnp.einsum("bse,he->sbh", embeds, w1,
                       preferred_element_type=jnp.float32)
    xproj = (xproj + (b1 + bh).astype(jnp.float32)).astype(jnp.bfloat16)
    wh_bf = wh.astype(jnp.bfloat16)
    h = jnp.zeros((B, H), jnp.float32)
    outs = []
    for t in range(S):
        rec = jnp.dot(h.astype(jnp.bfloat16), wh_bf.T,
                      preferred_element_type=jnp.float32)
        h = act(xproj[t].astype(jnp.float32) + rec)
        outs.append(h)
    return jnp.stack(outs)


if __name__ == "__main__":
    # small deterministic config
    batch_size = 4
    seq_length = 8
    embedding_dim = 16
    hidden_dim = 32
    activation = "tanh"

    key = jax.random.PRNGKey(0)
    k_x, k_w1, k_b1, k_wh, k_bh = jax.random.split(key, 5)

    embeds = jax.random.normal(
        k_x, (batch_size, seq_length, embedding_dim), dtype=jnp.float32)

    # Linear(embedding_dim, hidden_dim): uniform(-1/sqrt(in), 1/sqrt(in))
    bound1 = 1.0 / math.sqrt(embedding_dim)
    w1 = jax.random.uniform(k_w1, (hidden_dim, embedding_dim),
                            minval=-bound1, maxval=bound1, dtype=jnp.float32)
    b1 = jax.random.uniform(k_b1, (hidden_dim,),
                            minval=-bound1, maxval=bound1, dtype=jnp.float32)

    # Linear(hidden_dim, hidden_dim)
    bound_h = 1.0 / math.sqrt(hidden_dim)
    wh = jax.random.uniform(k_wh, (hidden_dim, hidden_dim),
                            minval=-bound_h, maxval=bound_h, dtype=jnp.float32)
    bh = jax.random.uniform(k_bh, (hidden_dim,),
                            minval=-bound_h, maxval=bound_h, dtype=jnp.float32)

    out = rnn_forward(embeds, w1, b1, wh, bh, activation=activation)
    out = jax.block_until_ready(out)                  # (S, B, H)
    assert out.shape == (seq_length, batch_size, hidden_dim)

    # Tight check against a reference that reproduces the kernel's bf16-MXU /
    # f32-carry numerics (validates recurrence, chaining, padding, indexing).
    ref_match = _reference_rnn_bf16_matched(embeds, w1, b1, wh, bh, activation)
    err_m = float(jnp.max(jnp.abs(out - ref_match)))
    assert jnp.allclose(out, ref_match, atol=5e-3, rtol=5e-3), err_m

    # Looser check against the pure-f32 PyTorch-semantics reference; the gap is
    # only the bf16 rounding of the MXU operands / xproj storage.
    ref_f32 = _reference_rnn_f32(embeds, w1, b1, wh, bh, activation)
    err_f = float(jnp.max(jnp.abs(out - ref_f32)))
    assert jnp.allclose(out, ref_f32, atol=5e-2, rtol=5e-2), err_f

    print("KERNEL_OK")
</pallas_src>

<mosaic_0001>
module attributes {stable_mosaic.version = 11 : i64} {
  func.func @_rnn_kernel(%arg0: i32, %arg1: i32, %arg2: memref<8x32x128xbf16, #tpu.memory_space<vmem>>, %arg3: memref<128x128xbf16, #tpu.memory_space<vmem>>, %arg4: memref<8x32x128xf32, #tpu.memory_space<vmem>>, %arg5: memref<32x128xf32, #tpu.memory_space<vmem>>) attributes {dimension_semantics = [#tpu.dimension_semantics<parallel>, #tpu.dimension_semantics<arbitrary>], iteration_bounds = array<i64: 1, 1>, scalar_prefetch = 0 : i64, scratch_operands = 1 : i64, tpu.core_type = #tpu.core_type<tc>, window_params = [{transform_indices = @transform_0, window_bounds = array<i64: 8, 32, 128>}, {pipeline_mode = #tpu.pipeline_mode<synchronous>, transform_indices = @transform_1, window_bounds = array<i64: 128, 128>}, {transform_indices = @transform_2, window_bounds = array<i64: 8, 32, 128>}]} {
    %c0_i32 = arith.constant 0 : i32
    %0 = arith.cmpi eq, %arg1, %c0_i32 : i32
    %1 = arith.extui %0 : i1 to i32
    %c0_i32_0 = arith.constant 0 : i32
    %2 = arith.cmpi ne, %1, %c0_i32_0 : i32
    scf.if %2 {
      %cst_89 = arith.constant 0.000000e+00 : f32
      %200 = vector.broadcast %cst_89 : f32 to vector<32x128xf32>
      %c0_90 = arith.constant 0 : index
      %c0_91 = arith.constant 0 : index
      %201 = vector.load %arg5[%c0_90, %c0_91] : memref<32x128xf32, #tpu.memory_space<vmem>>, vector<32x128xf32>
      tpu.vector_store %arg5[%c0_90, %c0_91], %200 {strides = array<i32>} : memref<32x128xf32, #tpu.memory_space<vmem>>, vector<32x128xf32>,
    } else {
    }
    %c0 = arith.constant 0 : index
    %c0_1 = arith.constant 0 : index
    %3 = vector.load %arg3[%c0, %c0_1] : memref<128x128xbf16, #tpu.memory_space<vmem>>, vector<128x128xbf16>
    %c0_2 = arith.constant 0 : index
    %c0_3 = arith.constant 0 : index
    %4 = vector.load %arg5[%c0_2, %c0_3] : memref<32x128xf32, #tpu.memory_space<vmem>>, vector<16x128xf32>
    %c16 = arith.constant 16 : index
    %c0_4 = arith.constant 0 : index
    %5 = vector.load %arg5[%c16, %c0_4] : memref<32x128xf32, #tpu.memory_space<vmem>>, vector<16x128xf32>
    %c0_i32_5 = arith.constant 0 : i32
    %6 = arith.truncf %4 : vector<16x128xf32> to vector<16x128xbf16>
    %cst = arith.constant dense<0.000000e+00> : vector<16x128xf32>
    %7 = tpu.matmul %6, %3, %cst {dimension_numbers = #tpu.dot_dimension_numbers<[1], [0], [0], [1], [0, 0, 1, 1], [], []>} : vector<16x128xbf16>, vector<128x128xbf16>, vector<16x128xf32> -> vector<16x128xf32>
    %8 = arith.index_cast %c0_i32_5 : i32 to index
    %c0_6 = arith.constant 0 : index
    %c0_7 = arith.constant 0 : index
    %9 = vector.load %arg2[%8, %c0_6, %c0_7] : memref<8x32x128xbf16, #tpu.memory_space<vmem>>, vector<1x16x128xbf16>
    %10 = vector.shape_cast %9 : vector<1x16x128xbf16> to vector<16x128xbf16>
    %11 = arith.extf %10 : vector<16x128xbf16> to vector<16x128xf32>
    %12 = arith.addf %11, %7 : vector<16x128xf32>
    %13 = arith.truncf %5 : vector<16x128xf32> to vector<16x128xbf16>
    %cst_8 = arith.constant dense<0.000000e+00> : vector<16x128xf32>
    %14 = tpu.matmul %13, %3, %cst_8 {dimension_numbers = #tpu.dot_dimension_numbers<[1], [0], [0], [1], [0, 0, 1, 1], [], []>} : vector<16x128xbf16>, vector<128x128xbf16>, vector<16x128xf32> -> vector<16x128xf32>
    %15 = arith.index_cast %c0_i32_5 : i32 to index
    %c16_9 = arith.constant 16 : index
    %c0_10 = arith.constant 0 : index
    %16 = vector.load %arg2[%15, %c16_9, %c0_10] : memref<8x32x128xbf16, #tpu.memory_space<vmem>>, vector<1x16x128xbf16>
    %17 = vector.shape_cast %16 : vector<1x16x128xbf16> to vector<16x128xbf16>
    %18 = arith.extf %17 : vector<16x128xbf16> to vector<16x128xf32>
    %19 = arith.addf %18, %14 : vector<16x128xf32>
    %20 = math.tanh %12 : vector<16x128xf32>
    %21 = arith.index_cast %c0_i32_5 : i32 to index
    %c0_11 = arith.constant 0 : index
    %c0_12 = arith.constant 0 : index
    %22 = vector.load %arg4[%21, %c0_11, %c0_12] : memref<8x32x128xf32, #tpu.memory_space<vmem>>, vector<1x16x128xf32>
    %23 = vector.shape_cast %22 : vector<1x16x128xf32> to vector<16x128xf32>
    %24 = vector.shape_cast %20 : vector<16x128xf32> to vector<1x16x128xf32>
    tpu.vector_store %arg4[%21, %c0_11, %c0_12], %24 {strides = array<i32>} : memref<8x32x128xf32, #tpu.memory_space<vmem>>, vector<1x16x128xf32>,
    %25 = math.tanh %19 : vector<16x128xf32>
    %26 = arith.index_cast %c0_i32_5 : i32 to index
    %c16_13 = arith.constant 16 : index
    %c0_14 = arith.constant 0 : index
    %27 = vector.load %arg4[%26, %c16_13, %c0_14] : memref<8x32x128xf32, #tpu.memory_space<vmem>>, vector<1x16x128xf32>
    %28 = vector.shape_cast %27 : vector<1x16x128xf32> to vector<16x128xf32>
    %29 = vector.shape_cast %25 : vector<16x128xf32> to vector<1x16x128xf32>
    tpu.vector_store %arg4[%26, %c16_13, %c0_14], %29 {strides = array<i32>} : memref<8x32x128xf32, #tpu.memory_space<vmem>>, vector<1x16x128xf32>,
    %c1_i32 = arith.constant 1 : i32
    %30 = arith.truncf %20 : vector<16x128xf32> to vector<16x128xbf16>
    %cst_15 = arith.constant dense<0.000000e+00> : vector<16x128xf32>
    %31 = tpu.matmul %30, %3, %cst_15 {dimension_numbers = #tpu.dot_dimension_numbers<[1], [0], [0], [1], [0, 0, 1, 1], [], []>} : vector<16x128xbf16>, vector<128x128xbf16>, vector<16x128xf32> -> vector<16x128xf32>
    %32 = arith.index_cast %c1_i32 : i32 to index
    %c0_16 = arith.constant 0 : index
    %c0_17 = arith.constant 0 : index
    %33 = vector.load %arg2[%32, %c0_16, %c0_17] : memref<8x32x128xbf16, #tpu.memory_space<vmem>>, vector<1x16x128xbf16>
    %34 = vector.shape_cast %33 : vector<1x16x128xbf16> to vector<16x128xbf16>
    %35 = arith.extf %34 : vector<16x128xbf16> to vector<16x128xf32>
    %36 = arith.addf %35, %31 : vector<16x128xf32>
    %37 = arith.truncf %25 : vector<16x128xf32> to vector<16x128xbf16>
    %cst_18 = arith.constant dense<0.000000e+00> : vector<16x128xf32>
    %38 = tpu.matmul %37, %3, %cst_18 {dimension_numbers = #tpu.dot_dimension_numbers<[1], [0], [0], [1], [0, 0, 1, 1], [], []>} : vector<16x128xbf16>, vector<128x128xbf16>, vector<16x128xf32> -> vector<16x128xf32>
    %39 = arith.index_cast %c1_i32 : i32 to index
    %c16_19 = arith.constant 16 : index
    %c0_20 = arith.constant 0 : index
    %40 = vector.load %arg2[%39, %c16_19, %c0_20] : memref<8x32x128xbf16, #tpu.memory_space<vmem>>, vector<1x16x128xbf16>
    %41 = vector.shape_cast %40 : vector<1x16x128xbf16> to vector<16x128xbf16>
    %42 = arith.extf %41 : vector<16x128xbf16> to vector<16x128xf32>
    %43 = arith.addf %42, %38 : vector<16x128xf32>
    %44 = math.tanh %36 : vector<16x128xf32>
    %45 = arith.index_cast %c1_i32 : i32 to index
    %c0_21 = arith.constant 0 : index
    %c0_22 = arith.constant 0 : index
    %46 = vector.load %arg4[%45, %c0_21, %c0_22] : memref<8x32x128xf32, #tpu.memory_space<vmem>>, vector<1x16x128xf32>
    %47 = vector.shape_cast %46 : vector<1x16x128xf32> to vector<16x128xf32>
    %48 = vector.shape_cast %44 : vector<16x128xf32> to vector<1x16x128xf32>
    tpu.vector_store %arg4[%45, %c0_21, %c0_22], %48 {strides = array<i32>} : memref<8x32x128xf32, #tpu.memory_space<vmem>>, vector<1x16x128xf32>,
    %49 = math.tanh %43 : vector<16x128xf32>
    %50 = arith.index_cast %c1_i32 : i32 to index
    %c16_23 = arith.constant 16 : index
    %c0_24 = arith.constant 0 : index
    %51 = vector.load %arg4[%50, %c16_23, %c0_24] : memref<8x32x128xf32, #tpu.memory_space<vmem>>, vector<1x16x128xf32>
    %52 = vector.shape_cast %51 : vector<1x16x128xf32> to vector<16x128xf32>
    %53 = vector.shape_cast %49 : vector<16x128xf32> to vector<1x16x128xf32>
    tpu.vector_store %arg4[%50, %c16_23, %c0_24], %53 {strides = array<i32>} : memref<8x32x128xf32, #tpu.memory_space<vmem>>, vector<1x16x128xf32>,
    %c2_i32 = arith.constant 2 : i32
    %54 = arith.truncf %44 : vector<16x128xf32> to vector<16x128xbf16>
    %cst_25 = arith.constant dense<0.000000e+00> : vector<16x128xf32>
    %55 = tpu.matmul %54, %3, %cst_25 {dimension_numbers = #tpu.dot_dimension_numbers<[1], [0], [0], [1], [0, 0, 1, 1], [], []>} : vector<16x128xbf16>, vector<128x128xbf16>, vector<16x128xf32> -> vector<16x128xf32>
    %56 = arith.index_cast %c2_i32 : i32 to index
    %c0_26 = arith.constant 0 : index
    %c0_27 = arith.constant 0 : index
    %57 = vector.load %arg2[%56, %c0_26, %c0_27] : memref<8x32x128xbf16, #tpu.memory_space<vmem>>, vector<1x16x128xbf16>
    %58 = vector.shape_cast %57 : vector<1x16x128xbf16> to vector<16x128xbf16>
    %59 = arith.extf %58 : vector<16x128xbf16> to vector<16x128xf32>
    %60 = arith.addf %59, %55 : vector<16x128xf32>
    %61 = arith.truncf %49 : vector<16x128xf32> to vector<16x128xbf16>
    %cst_28 = arith.constant dense<0.000000e+00> : vector<16x128xf32>
    %62 = tpu.matmul %61, %3, %cst_28 {dimension_numbers = #tpu.dot_dimension_numbers<[1], [0], [0], [1], [0, 0, 1, 1], [], []>} : vector<16x128xbf16>, vector<128x128xbf16>, vector<16x128xf32> -> vector<16x128xf32>
    %63 = arith.index_cast %c2_i32 : i32 to index
    %c16_29 = arith.constant 16 : index
    %c0_30 = arith.constant 0 : index
    %64 = vector.load %arg2[%63, %c16_29, %c0_30] : memref<8x32x128xbf16, #tpu.memory_space<vmem>>, vector<1x16x128xbf16>
    %65 = vector.shape_cast %64 : vector<1x16x128xbf16> to vector<16x128xbf16>
    %66 = arith.extf %65 : vector<16x128xbf16> to vector<16x128xf32>
    %67 = arith.addf %66, %62 : vector<16x128xf32>
    %68 = math.tanh %60 : vector<16x128xf32>
    %69 = arith.index_cast %c2_i32 : i32 to index
    %c0_31 = arith.constant 0 : index
    %c0_32 = arith.constant 0 : index
    %70 = vector.load %arg4[%69, %c0_31, %c0_32] : memref<8x32x128xf32, #tpu.memory_space<vmem>>, vector<1x16x128xf32>
    %71 = vector.shape_cast %70 : vector<1x16x128xf32> to vector<16x128xf32>
    %72 = vector.shape_cast %68 : vector<16x128xf32> to vector<1x16x128xf32>
    tpu.vector_store %arg4[%69, %c0_31, %c0_32], %72 {strides = array<i32>} : memref<8x32x128xf32, #tpu.memory_space<vmem>>, vector<1x16x128xf32>,
    %73 = math.tanh %67 : vector<16x128xf32>
    %74 = arith.index_cast %c2_i32 : i32 to index
    %c16_33 = arith.constant 16 : index
    %c0_34 = arith.constant 0 : index
    %75 = vector.load %arg4[%74, %c16_33, %c0_34] : memref<8x32x128xf32, #tpu.memory_space<vmem>>, vector<1x16x128xf32>
    %76 = vector.shape_cast %75 : vector<1x16x128xf32> to vector<16x128xf32>
    %77 = vector.shape_cast %73 : vector<16x128xf32> to vector<1x16x128xf32>
    tpu.vector_store %arg4[%74, %c16_33, %c0_34], %77 {strides = array<i32>} : memref<8x32x128xf32, #tpu.memory_space<vmem>>, vector<1x16x128xf32>,
    %c3_i32 = arith.constant 3 : i32
    %78 = arith.truncf %68 : vector<16x128xf32> to vector<16x128xbf16>
    %cst_35 = arith.constant dense<0.000000e+00> : vector<16x128xf32>
    %79 = tpu.matmul %78, %3, %cst_35 {dimension_numbers = #tpu.dot_dimension_numbers<[1], [0], [0], [1], [0, 0, 1, 1], [], []>} : vector<16x128xbf16>, vector<128x128xbf16>, vector<16x128xf32> -> vector<16x128xf32>
    %80 = arith.index_cast %c3_i32 : i32 to index
    %c0_36 = arith.constant 0 : index
    %c0_37 = arith.constant 0 : index
    %81 = vector.load %arg2[%80, %c0_36, %c0_37] : memref<8x32x128xbf16, #tpu.memory_space<vmem>>, vector<1x16x128xbf16>
    %82 = vector.shape_cast %81 : vector<1x16x128xbf16> to vector<16x128xbf16>
    %83 = arith.extf %82 : vector<16x128xbf16> to vector<16x128xf32>
    %84 = arith.addf %83, %79 : vector<16x128xf32>
    %85 = arith.truncf %73 : vector<16x128xf32> to vector<16x128xbf16>
    %cst_38 = arith.constant dense<0.000000e+00> : vector<16x128xf32>
    %86 = tpu.matmul %85, %3, %cst_38 {dimension_numbers = #tpu.dot_dimension_numbers<[1], [0], [0], [1], [0, 0, 1, 1], [], []>} : vector<16x128xbf16>, vector<128x128xbf16>, vector<16x128xf32> -> vector<16x128xf32>
    %87 = arith.index_cast %c3_i32 : i32 to index
    %c16_39 = arith.constant 16 : index
    %c0_40 = arith.constant 0 : index
    %88 = vector.load %arg2[%87, %c16_39, %c0_40] : memref<8x32x128xbf16, #tpu.memory_space<vmem>>, vector<1x16x128xbf16>
    %89 = vector.shape_cast %88 : vector<1x16x128xbf16> to vector<16x128xbf16>
    %90 = arith.extf %89 : vector<16x128xbf16> to vector<16x128xf32>
    %91 = arith.addf %90, %86 : vector<16x128xf32>
    %92 = math.tanh %84 : vector<16x128xf32>
    %93 = arith.index_cast %c3_i32 : i32 to index
    %c0_41 = arith.constant 0 : index
    %c0_42 = arith.constant 0 : index
    %94 = vector.load %arg4[%93, %c0_41, %c0_42] : memref<8x32x128xf32, #tpu.memory_space<vmem>>, vector<1x16x128xf32>
    %95 = vector.shape_cast %94 : vector<1x16x128xf32> to vector<16x128xf32>
    %96 = vector.shape_cast %92 : vector<16x128xf32> to vector<1x16x128xf32>
    tpu.vector_store %arg4[%93, %c0_41, %c0_42], %96 {strides = array<i32>} : memref<8x32x128xf32, #tpu.memory_space<vmem>>, vector<1x16x128xf32>,
    %97 = math.tanh %91 : vector<16x128xf32>
    %98 = arith.index_cast %c3_i32 : i32 to index
    %c16_43 = arith.constant 16 : index
    %c0_44 = arith.constant 0 : index
    %99 = vector.load %arg4[%98, %c16_43, %c0_44] : memref<8x32x128xf32, #tpu.memory_space<vmem>>, vector<1x16x128xf32>
    %100 = vector.shape_cast %99 : vector<1x16x128xf32> to vector<16x128xf32>
    %101 = vector.shape_cast %97 : vector<16x128xf32> to vector<1x16x128xf32>
    tpu.vector_store %arg4[%98, %c16_43, %c0_44], %101 {strides = array<i32>} : memref<8x32x128xf32, #tpu.memory_space<vmem>>, vector<1x16x128xf32>,
    %c4_i32 = arith.constant 4 : i32
    %102 = arith.truncf %92 : vector<16x128xf32> to vector<16x128xbf16>
    %cst_45 = arith.constant dense<0.000000e+00> : vector<16x128xf32>
    %103 = tpu.matmul %102, %3, %cst_45 {dimension_numbers = #tpu.dot_dimension_numbers<[1], [0], [0], [1], [0, 0, 1, 1], [], []>} : vector<16x128xbf16>, vector<128x128xbf16>, vector<16x128xf32> -> vector<16x128xf32>
    %104 = arith.index_cast %c4_i32 : i32 to index
    %c0_46 = arith.constant 0 : index
    %c0_47 = arith.constant 0 : index
    %105 = vector.load %arg2[%104, %c0_46, %c0_47] : memref<8x32x128xbf16, #tpu.memory_space<vmem>>, vector<1x16x128xbf16>
    %106 = vector.shape_cast %105 : vector<1x16x128xbf16> to vector<16x128xbf16>
    %107 = arith.extf %106 : vector<16x128xbf16> to vector<16x128xf32>
    %108 = arith.addf %107, %103 : vector<16x128xf32>
    %109 = arith.truncf %97 : vector<16x128xf32> to vector<16x128xbf16>
    %cst_48 = arith.constant dense<0.000000e+00> : vector<16x128xf32>
    %110 = tpu.matmul %109, %3, %cst_48 {dimension_numbers = #tpu.dot_dimension_numbers<[1], [0], [0], [1], [0, 0, 1, 1], [], []>} : vector<16x128xbf16>, vector<128x128xbf16>, vector<16x128xf32> -> vector<16x128xf32>
    %111 = arith.index_cast %c4_i32 : i32 to index
    %c16_49 = arith.constant 16 : index
    %c0_50 = arith.constant 0 : index
    %112 = vector.load %arg2[%111, %c16_49, %c0_50] : memref<8x32x128xbf16, #tpu.memory_space<vmem>>, vector<1x16x128xbf16>
    %113 = vector.shape_cast %112 : vector<1x16x128xbf16> to vector<16x128xbf16>
    %114 = arith.extf %113 : vector<16x128xbf16> to vector<16x128xf32>
    %115 = arith.addf %114, %110 : vector<16x128xf32>
    %116 = math.tanh %108 : vector<16x128xf32>
    %117 = arith.index_cast %c4_i32 : i32 to index
    %c0_51 = arith.constant 0 : index
    %c0_52 = arith.constant 0 : index
    %118 = vector.load %arg4[%117, %c0_51, %c0_52] : memref<8x32x128xf32, #tpu.memory_space<vmem>>, vector<1x16x128xf32>
    %119 = vector.shape_cast %118 : vector<1x16x128xf32> to vector<16x128xf32>
    %120 = vector.shape_cast %116 : vector<16x128xf32> to vector<1x16x128xf32>
    tpu.vector_store %arg4[%117, %c0_51, %c0_52], %120 {strides = array<i32>} : memref<8x32x128xf32, #tpu.memory_space<vmem>>, vector<1x16x128xf32>,
    %121 = math.tanh %115 : vector<16x128xf32>
    %122 = arith.index_cast %c4_i32 : i32 to index
    %c16_53 = arith.constant 16 : index
    %c0_54 = arith.constant 0 : index
    %123 = vector.load %arg4[%122, %c16_53, %c0_54] : memref<8x32x128xf32, #tpu.memory_space<vmem>>, vector<1x16x128xf32>
    %124 = vector.shape_cast %123 : vector<1x16x128xf32> to vector<16x128xf32>
    %125 = vector.shape_cast %121 : vector<16x128xf32> to vector<1x16x128xf32>
    tpu.vector_store %arg4[%122, %c16_53, %c0_54], %125 {strides = array<i32>} : memref<8x32x128xf32, #tpu.memory_space<vmem>>, vector<1x16x128xf32>,
    %c5_i32 = arith.constant 5 : i32
    %126 = arith.truncf %116 : vector<16x128xf32> to vector<16x128xbf16>
    %cst_55 = arith.constant dense<0.000000e+00> : vector<16x128xf32>
    %127 = tpu.matmul %126, %3, %cst_55 {dimension_numbers = #tpu.dot_dimension_numbers<[1], [0], [0], [1], [0, 0, 1, 1], [], []>} : vector<16x128xbf16>, vector<128x128xbf16>, vector<16x128xf32> -> vector<16x128xf32>
    %128 = arith.index_cast %c5_i32 : i32 to index
    %c0_56 = arith.constant 0 : index
    %c0_57 = arith.constant 0 : index
    %129 = vector.load %arg2[%128, %c0_56, %c0_57] : memref<8x32x128xbf16, #tpu.memory_space<vmem>>, vector<1x16x128xbf16>
    %130 = vector.shape_cast %129 : vector<1x16x128xbf16> to vector<16x128xbf16>
    %131 = arith.extf %130 : vector<16x128xbf16> to vector<16x128xf32>
    %132 = arith.addf %131, %127 : vector<16x128xf32>
    %133 = arith.truncf %121 : vector<16x128xf32> to vector<16x128xbf16>
    %cst_58 = arith.constant dense<0.000000e+00> : vector<16x128xf32>
    %134 = tpu.matmul %133, %3, %cst_58 {dimension_numbers = #tpu.dot_dimension_numbers<[1], [0], [0], [1], [0, 0, 1, 1], [], []>} : vector<16x128xbf16>, vector<128x128xbf16>, vector<16x128xf32> -> vector<16x128xf32>
    %135 = arith.index_cast %c5_i32 : i32 to index
    %c16_59 = arith.constant 16 : index
    %c0_60 = arith.constant 0 : index
    %136 = vector.load %arg2[%135, %c16_59, %c0_60] : memref<8x32x128xbf16, #tpu.memory_space<vmem>>, vector<1x16x128xbf16>
    %137 = vector.shape_cast %136 : vector<1x16x128xbf16> to vector<16x128xbf16>
    %138 = arith.extf %137 : vector<16x128xbf16> to vector<16x128xf32>
    %139 = arith.addf %138, %134 : vector<16x128xf32>
    %140 = math.tanh %132 : vector<16x128xf32>
    %141 = arith.index_cast %c5_i32 : i32 to index
    %c0_61 = arith.constant 0 : index
    %c0_62 = arith.constant 0 : index
    %142 = vector.load %arg4[%141, %c0_61, %c0_62] : memref<8x32x128xf32, #tpu.memory_space<vmem>>, vector<1x16x128xf32>
    %143 = vector.shape_cast %142 : vector<1x16x128xf32> to vector<16x128xf32>
    %144 = vector.shape_cast %140 : vector<16x128xf32> to vector<1x16x128xf32>
    tpu.vector_store %arg4[%141, %c0_61, %c0_62], %144 {strides = array<i32>} : memref<8x32x128xf32, #tpu.memory_space<vmem>>, vector<1x16x128xf32>,
    %145 = math.tanh %139 : vector<16x128xf32>
    %146 = arith.index_cast %c5_i32 : i32 to index
    %c16_63 = arith.constant 16 : index
    %c0_64 = arith.constant 0 : index
    %147 = vector.load %arg4[%146, %c16_63, %c0_64] : memref<8x32x128xf32, #tpu.memory_space<vmem>>, vector<1x16x128xf32>
    %148 = vector.shape_cast %147 : vector<1x16x128xf32> to vector<16x128xf32>
    %149 = vector.shape_cast %145 : vector<16x128xf32> to vector<1x16x128xf32>
    tpu.vector_store %arg4[%146, %c16_63, %c0_64], %149 {strides = array<i32>} : memref<8x32x128xf32, #tpu.memory_space<vmem>>, vector<1x16x128xf32>,
    %c6_i32 = arith.constant 6 : i32
    %150 = arith.truncf %140 : vector<16x128xf32> to vector<16x128xbf16>
    %cst_65 = arith.constant dense<0.000000e+00> : vector<16x128xf32>
    %151 = tpu.matmul %150, %3, %cst_65 {dimension_numbers = #tpu.dot_dimension_numbers<[1], [0], [0], [1], [0, 0, 1, 1], [], []>} : vector<16x128xbf16>, vector<128x128xbf16>, vector<16x128xf32> -> vector<16x128xf32>
    %152 = arith.index_cast %c6_i32 : i32 to index
    %c0_66 = arith.constant 0 : index
    %c0_67 = arith.constant 0 : index
    %153 = vector.load %arg2[%152, %c0_66, %c0_67] : memref<8x32x128xbf16, #tpu.memory_space<vmem>>, vector<1x16x128xbf16>
    %154 = vector.shape_cast %153 : vector<1x16x128xbf16> to vector<16x128xbf16>
    %155 = arith.extf %154 : vector<16x128xbf16> to vector<16x128xf32>
    %156 = arith.addf %155, %151 : vector<16x128xf32>
    %157 = arith.truncf %145 : vector<16x128xf32> to vector<16x128xbf16>
    %cst_68 = arith.constant dense<0.000000e+00> : vector<16x128xf32>
    %158 = tpu.matmul %157, %3, %cst_68 {dimension_numbers = #tpu.dot_dimension_numbers<[1], [0], [0], [1], [0, 0, 1, 1], [], []>} : vector<16x128xbf16>, vector<128x128xbf16>, vector<16x128xf32> -> vector<16x128xf32>
    %159 = arith.index_cast %c6_i32 : i32 to index
    %c16_69 = arith.constant 16 : index
    %c0_70 = arith.constant 0 : index
    %160 = vector.load %arg2[%159, %c16_69, %c0_70] : memref<8x32x128xbf16, #tpu.memory_space<vmem>>, vector<1x16x128xbf16>
    %161 = vector.shape_cast %160 : vector<1x16x128xbf16> to vector<16x128xbf16>
    %162 = arith.extf %161 : vector<16x128xbf16> to vector<16x128xf32>
    %163 = arith.addf %162, %158 : vector<16x128xf32>
    %164 = math.tanh %156 : vector<16x128xf32>
    %165 = arith.index_cast %c6_i32 : i32 to index
    %c0_71 = arith.constant 0 : index
    %c0_72 = arith.constant 0 : index
    %166 = vector.load %arg4[%165, %c0_71, %c0_72] : memref<8x32x128xf32, #tpu.memory_space<vmem>>, vector<1x16x128xf32>
    %167 = vector.shape_cast %166 : vector<1x16x128xf32> to vector<16x128xf32>
    %168 = vector.shape_cast %164 : vector<16x128xf32> to vector<1x16x128xf32>
    tpu.vector_store %arg4[%165, %c0_71, %c0_72], %168 {strides = array<i32>} : memref<8x32x128xf32, #tpu.memory_space<vmem>>, vector<1x16x128xf32>,
    %169 = math.tanh %163 : vector<16x128xf32>
    %170 = arith.index_cast %c6_i32 : i32 to index
    %c16_73 = arith.constant 16 : index
    %c0_74 = arith.constant 0 : index
    %171 = vector.load %arg4[%170, %c16_73, %c0_74] : memref<8x32x128xf32, #tpu.memory_space<vmem>>, vector<1x16x128xf32>
    %172 = vector.shape_cast %171 : vector<1x16x128xf32> to vector<16x128xf32>
    %173 = vector.shape_cast %169 : vector<16x128xf32> to vector<1x16x128xf32>
    tpu.vector_store %arg4[%170, %c16_73, %c0_74], %173 {strides = array<i32>} : memref<8x32x128xf32, #tpu.memory_space<vmem>>, vector<1x16x128xf32>,
    %c7_i32 = arith.constant 7 : i32
    %174 = arith.truncf %164 : vector<16x128xf32> to vector<16x128xbf16>
    %cst_75 = arith.constant dense<0.000000e+00> : vector<16x128xf32>
    %175 = tpu.matmul %174, %3, %cst_75 {dimension_numbers = #tpu.dot_dimension_numbers<[1], [0], [0], [1], [0, 0, 1, 1], [], []>} : vector<16x128xbf16>, vector<128x128xbf16>, vector<16x128xf32> -> vector<16x128xf32>
    %176 = arith.index_cast %c7_i32 : i32 to index
    %c0_76 = arith.constant 0 : index
    %c0_77 = arith.constant 0 : index
    %177 = vector.load %arg2[%176, %c0_76, %c0_77] : memref<8x32x128xbf16, #tpu.memory_space<vmem>>, vector<1x16x128xbf16>
    %178 = vector.shape_cast %177 : vector<1x16x128xbf16> to vector<16x128xbf16>
    %179 = arith.extf %178 : vector<16x128xbf16> to vector<16x128xf32>
    %180 = arith.addf %179, %175 : vector<16x128xf32>
    %181 = arith.truncf %169 : vector<16x128xf32> to vector<16x128xbf16>
    %cst_78 = arith.constant dense<0.000000e+00> : vector<16x128xf32>
    %182 = tpu.matmul %181, %3, %cst_78 {dimension_numbers = #tpu.dot_dimension_numbers<[1], [0], [0], [1], [0, 0, 1, 1], [], []>} : vector<16x128xbf16>, vector<128x128xbf16>, vector<16x128xf32> -> vector<16x128xf32>
    %183 = arith.index_cast %c7_i32 : i32 to index
    %c16_79 = arith.constant 16 : index
    %c0_80 = arith.constant 0 : index
    %184 = vector.load %arg2[%183, %c16_79, %c0_80] : memref<8x32x128xbf16, #tpu.memory_space<vmem>>, vector<1x16x128xbf16>
    %185 = vector.shape_cast %184 : vector<1x16x128xbf16> to vector<16x128xbf16>
    %186 = arith.extf %185 : vector<16x128xbf16> to vector<16x128xf32>
    %187 = arith.addf %186, %182 : vector<16x128xf32>
    %188 = math.tanh %180 : vector<16x128xf32>
    %189 = arith.index_cast %c7_i32 : i32 to index
    %c0_81 = arith.constant 0 : index
    %c0_82 = arith.constant 0 : index
    %190 = vector.load %arg4[%189, %c0_81, %c0_82] : memref<8x32x128xf32, #tpu.memory_space<vmem>>, vector<1x16x128xf32>
    %191 = vector.shape_cast %190 : vector<1x16x128xf32> to vector<16x128xf32>
    %192 = vector.shape_cast %188 : vector<16x128xf32> to vector<1x16x128xf32>
    tpu.vector_store %arg4[%189, %c0_81, %c0_82], %192 {strides = array<i32>} : memref<8x32x128xf32, #tpu.memory_space<vmem>>, vector<1x16x128xf32>,
    %193 = math.tanh %187 : vector<16x128xf32>
    %194 = arith.index_cast %c7_i32 : i32 to index
    %c16_83 = arith.constant 16 : index
    %c0_84 = arith.constant 0 : index
    %195 = vector.load %arg4[%194, %c16_83, %c0_84] : memref<8x32x128xf32, #tpu.memory_space<vmem>>, vector<1x16x128xf32>
    %196 = vector.shape_cast %195 : vector<1x16x128xf32> to vector<16x128xf32>
    %197 = vector.shape_cast %193 : vector<16x128xf32> to vector<1x16x128xf32>
    tpu.vector_store %arg4[%194, %c16_83, %c0_84], %197 {strides = array<i32>} : memref<8x32x128xf32, #tpu.memory_space<vmem>>, vector<1x16x128xf32>,
    %c8_i32 = arith.constant 8 : i32
    %c0_85 = arith.constant 0 : index
    %c0_86 = arith.constant 0 : index
    %198 = vector.load %arg5[%c0_85, %c0_86] : memref<32x128xf32, #tpu.memory_space<vmem>>, vector<16x128xf32>
    tpu.vector_store %arg5[%c0_85, %c0_86], %188 {strides = array<i32>} : memref<32x128xf32, #tpu.memory_space<vmem>>, vector<16x128xf32>,
    %c16_87 = arith.constant 16 : index
    %c0_88 = arith.constant 0 : index
    %199 = vector.load %arg5[%c16_87, %c0_88] : memref<32x128xf32, #tpu.memory_space<vmem>>, vector<16x128xf32>
    tpu.vector_store %arg5[%c16_87, %c0_88], %193 {strides = array<i32>} : memref<32x128xf32, #tpu.memory_space<vmem>>, vector<16x128xf32>,
    return
  }
  func.func @transform_0(%arg0: i32, %arg1: i32) -> (i32, i32, i32) {
    %c0_i32 = arith.constant 0 : i32
    %c0_i32_0 = arith.constant 0 : i32
    return %arg1, %arg0, %c0_i32 : i32, i32, i32
  }
  func.func @transform_1(%arg0: i32, %arg1: i32) -> (i32, i32) {
    %c0_i32 = arith.constant 0 : i32
    %c0_i32_0 = arith.constant 0 : i32
    %c0_i32_1 = arith.constant 0 : i32
    return %c0_i32, %c0_i32_0 : i32, i32
  }
  func.func @transform_2(%arg0: i32, %arg1: i32) -> (i32, i32, i32) {
    %c0_i32 = arith.constant 0 : i32
    %c0_i32_0 = arith.constant 0 : i32
    return %arg1, %arg0, %c0_i32 : i32, i32, i32
  }
}

</mosaic_0001>

<bundles_post_ra>
// kernel: tpu_custom_call.1
= control target key start
LH: loop header
LB: loop body
LE: loop exit
PB: predicated region body
PF: predicated region fallthrough
CT: control target
= control target key end

     0   :  { %7 = vsyncpa [#allocation4], 0  ;;  %s996_s0 = inlined_call_operand.hbm [shape: bf16[8,32,128], index: 0, kind: input, shape index: {}]   ;;  %s997_s1 = inlined_call_operand.hbm [shape: bf16[128,128], index: 1, kind: input, shape index: {}]   ;;  %s998_s2 = inlined_call_operand.hbm [shape: f32[8,32,128], index: 2, kind: output, shape index: {}]  }
   0x1   :  { %8 = vsyncpa [#allocation7], 0 }
   0x2   :  { %9 = vsyncpa [#allocation5], 0  ;;  %s14_s11 = sshll.u32 %s996_s0, 4  ;;  %s820_s12 = smov [#allocation3]   ;;  %s15_s11 = int_to_ptr.hbm [resolvable:$true] %s14_s11 }
   0x3   :  { %s16_s13 = sshll.u32 %s820_s12, 4  ;;  %s27_s16 = sshll.u32 %s997_s1, 4  ;;  %s17_s13 = int_to_ptr.vmem [resolvable:$true] %s16_s13  ;;  %s28_s16 = int_to_ptr.hbm [resolvable:$true] %s27_s16 }
   0x4   :  { %s821_s17 = smov 64   ;;  %s822_s18 = smov 4  }
   0x5   :  { %22 = dma.hbm_to_vmem [thread:$0]  %s15_s11, 2048, %s17_s13, [#allocation4], %s821_s17, %s821_s17, %s822_s18  }
   0x6   :  { %s823_s19 = smov [#allocation6]  }
   0x7   :  { %s29_s20 = sshll.u32 %s823_s19, 4  ;;  %s30_s20 = int_to_ptr.vmem [resolvable:$true] %s29_s20 }
   0x8   :  { %35 = dma.hbm_to_vmem [thread:$0]  %s28_s16, 1024, %s30_s20, [#allocation7], %s821_s17, %s821_s17, %s822_s18  }
   0x9   :  { %814 = dma.done.wait [#allocation4], 2048  }
   0xa   :  { %815 = vsyncadd [#allocation4], 4294965248 }
   0xb   :  { %816 = dma.done.wait [#allocation7], 1024  }
   0xc   :  { %817 = vsyncadd [#allocation7], 4294966272  ;;  %v849_v0 = vld [vmem:[#allocation6 + $0x38] sm:$0xff]  ;;  %v853_v1 = vld [vmem:[#allocation6 + $0x30] sm:$0xff]  ;;  %v824_v8 = vmov 0.0|0.0   ;;  %s825_s0 = smov [#allocation8]  }
   0xd   :  { %121 = vmatpush.bf16.msra.mxu0 %v849_v0  ;;  %142 = vmatpush.bf16.msra.mxu1 %v849_v0  ;;  %v859_v2 = vld [vmem:[#allocation6 + $0x28] sm:$0xff]  ;;  %v865_v3 = vld [vmem:[#allocation6 + $0x20] sm:$0xff]  ;;  %v871_v4 = vld [vmem:[#allocation6 + $0x18] sm:$0xff]  ;;  %s542_s1 = sshll.u32 %s825_s0, 4  ;;  %s544_s23 = sshll.u32 %s998_s2, 4  ;;  %s543_s1 = int_to_ptr.vmem [resolvable:$true] %s542_s1  ;;  %s545_s23 = int_to_ptr.hbm [resolvable:$true] %s544_s23 }
   0xe   :  { %171 = vmatpush.bf16.msra.mxu2 %v849_v0  ;;  %193 = vmatpush.bf16.msra.mxu3 %v849_v0  ;;  %v877_v5 = vld [vmem:[#allocation6 + $0x10] sm:$0xff]  ;;  %v883_v6 = vld [vmem:[#allocation6 + $0x8] sm:$0xff]  ;;  %v889_v7 = vld [vmem:[#allocation6] sm:$0xff]  ;;  %s826_s24 = smov 128   ;;  %s827_s25 = smov 8  }
   0xf   :  { %v599_v9 = vld [vmem:[#allocation3] sm:$0xff]   ;;  %v662_v10 = vld [vmem:[#allocation3 + $0x8] sm:$0xff]   ;;  %v607_v29 = vld [vmem:[#allocation3 + $0x10] sm:$0xff]  }
  0x10   :  { %v600_v11 = vunpack.c.l.bf16 %v599_v9  ;;  %v604_v12 = vunpack.c.l.bf16 %v662_v10  ;;  %v601_v17 = vunpack.c.h.bf16 %v599_v9  ;;  %v605_v18 = vunpack.c.h.bf16 %v662_v10  ;;  %v663_v30 = vld [vmem:[#allocation3 + $0x18] sm:$0xff]   ;;  %v615_v49 = vld [vmem:[#allocation3 + $0x20] sm:$0xff]   ;;  %v664_v50 = vld [vmem:[#allocation3 + $0x28] sm:$0xff]  }
  0x11   :  { %122 = vmatpush.bf16.msra.mxu0 %v853_v1  ;;  %143 = vmatpush.bf16.msra.mxu1 %v853_v1  ;;  %v608_v31 = vunpack.c.l.bf16 %v607_v29  ;;  %v612_v32 = vunpack.c.l.bf16 %v663_v30  ;;  %v609_v37 = vunpack.c.h.bf16 %v607_v29  ;;  %v613_v38 = vunpack.c.h.bf16 %v663_v30 }
  0x12   :  { %172 = vmatpush.bf16.msra.mxu2 %v853_v1  ;;  %194 = vmatpush.bf16.msra.mxu3 %v853_v1  ;;  %v616_v51 = vunpack.c.l.bf16 %v615_v49  ;;  %v620_v52 = vunpack.c.l.bf16 %v664_v50  ;;  %v617_v57 = vunpack.c.h.bf16 %v615_v49  ;;  %v621_v58 = vunpack.c.h.bf16 %v664_v50 }
  0x15   :  { %123 = vmatpush.bf16.msra.mxu0 %v859_v2  ;;  %144 = vmatpush.bf16.msra.mxu1 %v859_v2 }
  0x16   :  { %173 = vmatpush.bf16.msra.mxu2 %v859_v2  ;;  %195 = vmatpush.bf16.msra.mxu3 %v859_v2 }
  0x19   :  { %124 = vmatpush.bf16.msra.mxu0 %v865_v3  ;;  %145 = vmatpush.bf16.msra.mxu1 %v865_v3 }
  0x1a   :  { %174 = vmatpush.bf16.msra.mxu2 %v865_v3  ;;  %196 = vmatpush.bf16.msra.mxu3 %v865_v3 }
  0x1d   :  { %125 = vmatpush.bf16.msra.mxu0 %v871_v4  ;;  %146 = vmatpush.bf16.msra.mxu1 %v871_v4 }
  0x1e   :  { %175 = vmatpush.bf16.msra.mxu2 %v871_v4  ;;  %197 = vmatpush.bf16.msra.mxu3 %v871_v4 }
  0x21   :  { %126 = vmatpush.bf16.msra.mxu0 %v877_v5  ;;  %147 = vmatpush.bf16.msra.mxu1 %v877_v5 }
  0x22   :  { %176 = vmatpush.bf16.msra.mxu2 %v877_v5  ;;  %198 = vmatpush.bf16.msra.mxu3 %v877_v5 }
  0x25   :  { %127 = vmatpush.bf16.msra.mxu0 %v883_v6  ;;  %148 = vmatpush.bf16.msra.mxu1 %v883_v6 }
  0x26   :  { %177 = vmatpush.bf16.msra.mxu2 %v883_v6  ;;  %199 = vmatpush.bf16.msra.mxu3 %v883_v6 }
  0x29   :  { %128 = vmatpush.bf16.msra.mxu0 %v889_v7  ;;  %149 = vmatpush.bf16.msra.mxu1 %v889_v7 }
  0x2a   :  { %178 = vmatpush.bf16.msra.mxu2 %v889_v7  ;;  %200 = vmatpush.bf16.msra.mxu3 %v889_v7 }
  0x2c   :  { %129 = vmatmul.bf16.vlgmr.msra.gmra.mxu0 %v824_v8  ;;  %150 = vmatmul.bf16.vlgmr.msra.gmra.mxu1 %v824_v8 }
  0x2d   :  { %223 = vmatpush.bf16.msrb.mxu0 %v849_v0  ;;  %245 = vmatpush.bf16.msrb.mxu1 %v849_v0 }
  0x2e   :  { %275 = vmatpush.bf16.msrb.mxu2 %v849_v0  ;;  %297 = vmatpush.bf16.msrb.mxu3 %v849_v0 }
  0x31   :  { %224 = vmatpush.bf16.msrb.mxu0 %v853_v1  ;;  %246 = vmatpush.bf16.msrb.mxu1 %v853_v1 }
  0x32   :  { %276 = vmatpush.bf16.msrb.mxu2 %v853_v1  ;;  %298 = vmatpush.bf16.msrb.mxu3 %v853_v1 }
  0x35   :  { %225 = vmatpush.bf16.msrb.mxu0 %v859_v2  ;;  %247 = vmatpush.bf16.msrb.mxu1 %v859_v2 }
  0x36   :  { %277 = vmatpush.bf16.msrb.mxu2 %v859_v2  ;;  %299 = vmatpush.bf16.msrb.mxu3 %v859_v2 }
  0x39   :  { %226 = vmatpush.bf16.msrb.mxu0 %v865_v3  ;;  %248 = vmatpush.bf16.msrb.mxu1 %v865_v3 }
  0x3a   :  { %278 = vmatpush.bf16.msrb.mxu2 %v865_v3  ;;  %300 = vmatpush.bf16.msrb.mxu3 %v865_v3 }
  0x3d   :  { %227 = vmatpush.bf16.msrb.mxu0 %v871_v4  ;;  %249 = vmatpush.bf16.msrb.mxu1 %v871_v4 }
  0x3e   :  { %279 = vmatpush.bf16.msrb.mxu2 %v871_v4  ;;  %301 = vmatpush.bf16.msrb.mxu3 %v871_v4 }
  0x41   :  { %228 = vmatpush.bf16.msrb.mxu0 %v877_v5  ;;  %250 = vmatpush.bf16.msrb.mxu1 %v877_v5 }
  0x42   :  { %280 = vmatpush.bf16.msrb.mxu2 %v877_v5  ;;  %302 = vmatpush.bf16.msrb.mxu3 %v877_v5 }
  0x45   :  { %229 = vmatpush.bf16.msrb.mxu0 %v883_v6  ;;  %251 = vmatpush.bf16.msrb.mxu1 %v883_v6 }
  0x46   :  { %281 = vmatpush.bf16.msrb.mxu2 %v883_v6  ;;  %303 = vmatpush.bf16.msrb.mxu3 %v883_v6 }
  0x49   :  { %230 = vmatpush.bf16.msrb.mxu0 %v889_v7  ;;  %252 = vmatpush.bf16.msrb.mxu1 %v889_v7 }
  0x4a   :  { %282 = vmatpush.bf16.msrb.mxu2 %v889_v7  ;;  %304 = vmatpush.bf16.msrb.mxu3 %v889_v7 }
  0x4d   :  { %327 = vmatpush.bf16.msra.mxu0 %v849_v0  ;;  %349 = vmatpush.bf16.msra.mxu1 %v849_v0 }
  0x51   :  { %328 = vmatpush.bf16.msra.mxu0 %v853_v1  ;;  %350 = vmatpush.bf16.msra.mxu1 %v853_v1 }
  0x55   :  { %329 = vmatpush.bf16.msra.mxu0 %v859_v2  ;;  %351 = vmatpush.bf16.msra.mxu1 %v859_v2 }
  0x59   :  { %330 = vmatpush.bf16.msra.mxu0 %v865_v3  ;;  %352 = vmatpush.bf16.msra.mxu1 %v865_v3 }
  0x5d   :  { %331 = vmatpush.bf16.msra.mxu0 %v871_v4  ;;  %353 = vmatpush.bf16.msra.mxu1 %v871_v4 }
  0x61   :  { %332 = vmatpush.bf16.msra.mxu0 %v877_v5  ;;  %354 = vmatpush.bf16.msra.mxu1 %v877_v5 }
  0x65   :  { %333 = vmatpush.bf16.msra.mxu0 %v883_v6  ;;  %355 = vmatpush.bf16.msra.mxu1 %v883_v6 }
  0x69   :  { %334 = vmatpush.bf16.msra.mxu0 %v889_v7  ;;  %356 = vmatpush.bf16.msra.mxu1 %v889_v7 }
  0xa9   :  { %v130_v13 = vpop.f32.mrf.mxu0  ;;  %v151_v14 = vpop.f32.mrf.mxu1 }
  0xaa   :  { %v139_v15 = vadd.f32 %v600_v11, %v130_v13  ;;  %v160_v16 = vadd.f32 %v604_v12, %v151_v14 }
  0xac   :  { %678 = vtanh.f32 %v139_v15 }
  0xad   :  { %680 = vtanh.f32 %v160_v16 }
  0xb1   :  { %v132_v19 = vpop.f32.mrf.mxu0  ;;  %v153_v20 = vpop.f32.mrf.mxu1 }
  0xb2   :  { %v679_v21 = vpop.eup %678  ;;  %v140_v22 = vadd.f32 %v601_v17, %v132_v19  ;;  %v161_v23 = vadd.f32 %v605_v18, %v153_v20 }
  0xb3   :  { %v681_v24 = vpop.eup %680  ;;  %164 = vst [vmem:[#allocation8] sm:$0xff] %v679_v21 }
  0xb4   :  { %168 = vst [vmem:[#allocation8 + $0x10] sm:$0xff] %v681_v24  ;;  %682 = vtanh.f32 %v140_v22 }
  0xb5   :  { %684 = vtanh.f32 %v161_v23 }
  0xba   :  { %v683_v25 = vpop.eup %682 }
  0xbb   :  { %v685_v26 = vpop.eup %684  ;;  %165 = vst [vmem:[#allocation8 + $0x8] sm:$0xff] %v683_v25  ;;  %v170_v27 = vpack.c.bf16 %v683_v25, %v679_v21  ;;  %v631_v25 = vld [vmem:[#allocation3 + $0x40] sm:$0xff]  }
  0xbc   :  { %169 = vst [vmem:[#allocation8 + $0x18] sm:$0xff] %v685_v26  ;;  %v192_v28 = vpack.c.bf16 %v685_v26, %v681_v24  ;;  %v666_v26 = vld [vmem:[#allocation3 + $0x48] sm:$0xff]  }
  0xbd   :  { %179 = vmatmul.bf16.vlgmr.msra.gmra.mxu2 %v170_v27  ;;  %v632_v27 = vunpack.c.l.bf16 %v631_v25 }
  0xbe   :  { %201 = vmatmul.bf16.vlgmr.msra.gmra.mxu3 %v192_v28  ;;  %379 = vmatpush.bf16.msra.mxu2 %v849_v0  ;;  %v636_v28 = vunpack.c.l.bf16 %v666_v26 }
  0xbf   :  { %401 = vmatpush.bf16.msra.mxu3 %v849_v0 }
  0xc2   :  { %380 = vmatpush.bf16.msra.mxu2 %v853_v1 }
  0xc3   :  { %402 = vmatpush.bf16.msra.mxu3 %v853_v1 }
  0xc6   :  { %381 = vmatpush.bf16.msra.mxu2 %v859_v2 }
  0xc7   :  { %403 = vmatpush.bf16.msra.mxu3 %v859_v2 }
  0xca   :  { %382 = vmatpush.bf16.msra.mxu2 %v865_v3 }
  0xcb   :  { %404 = vmatpush.bf16.msra.mxu3 %v865_v3 }
  0xce   :  { %383 = vmatpush.bf16.msra.mxu2 %v871_v4 }
  0xcf   :  { %405 = vmatpush.bf16.msra.mxu3 %v871_v4 }
  0xd2   :  { %384 = vmatpush.bf16.msra.mxu2 %v877_v5 }
  0xd3   :  { %406 = vmatpush.bf16.msra.mxu3 %v877_v5 }
  0xd6   :  { %385 = vmatpush.bf16.msra.mxu2 %v883_v6 }
  0xd7   :  { %407 = vmatpush.bf16.msra.mxu3 %v883_v6 }
  0xda   :  { %386 = vmatpush.bf16.msra.mxu2 %v889_v7 }
  0xdb   :  { %408 = vmatpush.bf16.msra.mxu3 %v889_v7 }
 0x140   :  { %v180_v33 = vpop.f32.mrf.mxu2 }
 0x141   :  { %v190_v34 = vadd.f32 %v608_v31, %v180_v33  ;;  %v202_v35 = vpop.f32.mrf.mxu3  ;;  %v633_v33 = vunpack.c.h.bf16 %v631_v25 }
 0x142   :  { %v211_v36 = vadd.f32 %v612_v32, %v202_v35 }
 0x143   :  { %686 = vtanh.f32 %v190_v34  ;;  %v637_v34 = vunpack.c.h.bf16 %v666_v26 }
 0x144   :  { %688 = vtanh.f32 %v211_v36 }
 0x148   :  { %v182_v39 = vpop.f32.mrf.mxu2 }
 0x149   :  { %v687_v40 = vpop.eup %686  ;;  %v191_v41 = vadd.f32 %v609_v37, %v182_v39  ;;  %v204_v42 = vpop.f32.mrf.mxu3 }
 0x14a   :  { %v689_v43 = vpop.eup %688  ;;  %216 = vst [vmem:[#allocation8 + $0x20] sm:$0xff] %v687_v40  ;;  %v212_v44 = vadd.f32 %v613_v38, %v204_v42 }
 0x14b   :  { %220 = vst [vmem:[#allocation8 + $0x30] sm:$0xff] %v689_v43  ;;  %690 = vtanh.f32 %v191_v41 }
 0x14c   :  { %692 = vtanh.f32 %v212_v44 }
 0x151   :  { %v691_v45 = vpop.eup %690 }
 0x152   :  { %v693_v46 = vpop.eup %692  ;;  %217 = vst [vmem:[#allocation8 + $0x28] sm:$0xff] %v691_v45  ;;  %v222_v47 = vpack.c.bf16 %v691_v45, %v687_v40  ;;  %v639_v45 = vld [vmem:[#allocation3 + $0x50] sm:$0xff]  }
 0x153   :  { %221 = vst [vmem:[#allocation8 + $0x38] sm:$0xff] %v693_v46  ;;  %v244_v48 = vpack.c.bf16 %v693_v46, %v689_v43  ;;  %v667_v46 = vld [vmem:[#allocation3 + $0x58] sm:$0xff]  }
 0x154   :  { %231 = vmatmul.bf16.vlgmr.msrb.gmra.mxu0 %v222_v47  ;;  %v640_v47 = vunpack.c.l.bf16 %v639_v45 }
 0x155   :  { %253 = vmatmul.bf16.vlgmr.msrb.gmra.mxu1 %v244_v48  ;;  %431 = vmatpush.bf16.msrb.mxu0 %v849_v0  ;;  %v644_v48 = vunpack.c.l.bf16 %v667_v46 }
 0x156   :  { %453 = vmatpush.bf16.msrb.mxu1 %v849_v0 }
 0x159   :  { %432 = vmatpush.bf16.msrb.mxu0 %v853_v1 }
 0x15a   :  { %454 = vmatpush.bf16.msrb.mxu1 %v853_v1 }
 0x15d   :  { %433 = vmatpush.bf16.msrb.mxu0 %v859_v2 }
 0x15e   :  { %455 = vmatpush.bf16.msrb.mxu1 %v859_v2 }
 0x161   :  { %434 = vmatpush.bf16.msrb.mxu0 %v865_v3 }
 0x162   :  { %456 = vmatpush.bf16.msrb.mxu1 %v865_v3 }
 0x165   :  { %435 = vmatpush.bf16.msrb.mxu0 %v871_v4 }
 0x166   :  { %457 = vmatpush.bf16.msrb.mxu1 %v871_v4 }
 0x169   :  { %436 = vmatpush.bf16.msrb.mxu0 %v877_v5 }
 0x16a   :  { %458 = vmatpush.bf16.msrb.mxu1 %v877_v5 }
 0x16d   :  { %437 = vmatpush.bf16.msrb.mxu0 %v883_v6 }
 0x16e   :  { %459 = vmatpush.bf16.msrb.mxu1 %v883_v6 }
 0x171   :  { %438 = vmatpush.bf16.msrb.mxu0 %v889_v7 }
 0x172   :  { %460 = vmatpush.bf16.msrb.mxu1 %v889_v7 }
 0x1d1   :  { %v232_v53 = vpop.f32.mrf.mxu0 }
 0x1d2   :  { %v242_v54 = vadd.f32 %v616_v51, %v232_v53  ;;  %v254_v55 = vpop.f32.mrf.mxu1  ;;  %v641_v53 = vunpack.c.h.bf16 %v639_v45 }
 0x1d3   :  { %v263_v56 = vadd.f32 %v620_v52, %v254_v55 }
 0x1d4   :  { %694 = vtanh.f32 %v242_v54  ;;  %v645_v54 = vunpack.c.h.bf16 %v667_v46 }
 0x1d5   :  { %696 = vtanh.f32 %v263_v56 }
 0x1d9   :  { %v234_v59 = vpop.f32.mrf.mxu0 }
 0x1da   :  { %v695_v60 = vpop.eup %694  ;;  %v243_v61 = vadd.f32 %v617_v57, %v234_v59  ;;  %v256_v62 = vpop.f32.mrf.mxu1 }
 0x1db   :  { %v697_v63 = vpop.eup %696  ;;  %268 = vst [vmem:[#allocation8 + $0x40] sm:$0xff] %v695_v60  ;;  %v264_v8 = vadd.f32 %v621_v58, %v256_v62 }
 0x1dc   :  { %272 = vst [vmem:[#allocation8 + $0x50] sm:$0xff] %v697_v63  ;;  %698 = vtanh.f32 %v243_v61 }
 0x1dd   :  { %700 = vtanh.f32 %v264_v8 }
 0x1e2   :  { %v699_v9 = vpop.eup %698 }
 0x1e3   :  { %v701_v10 = vpop.eup %700  ;;  %269 = vst [vmem:[#allocation8 + $0x48] sm:$0xff] %v699_v9  ;;  %v274_v11 = vpack.c.bf16 %v699_v9, %v695_v60  ;;  %v647_v9 = vld [vmem:[#allocation3 + $0x60] sm:$0xff]  }
 0x1e4   :  { %273 = vst [vmem:[#allocation8 + $0x58] sm:$0xff] %v701_v10  ;;  %v296_v12 = vpack.c.bf16 %v701_v10, %v697_v63  ;;  %v668_v10 = vld [vmem:[#allocation3 + $0x68] sm:$0xff]  }
 0x1e5   :  { %283 = vmatmul.bf16.vlgmr.msrb.gmra.mxu2 %v274_v11  ;;  %v648_v11 = vunpack.c.l.bf16 %v647_v9 }
 0x1e6   :  { %305 = vmatmul.bf16.vlgmr.msrb.gmra.mxu3 %v296_v12  ;;  %483 = vmatpush.bf16.msrb.mxu2 %v849_v0  ;;  %v652_v12 = vunpack.c.l.bf16 %v668_v10 }
 0x1e7   :  { %505 = vmatpush.bf16.msrb.mxu3 %v849_v0  ;;  %v623_v0 = vld [vmem:[#allocation3 + $0x30] sm:$0xff]  }
 0x1e8   :  { %v625_v16 = vunpack.c.h.bf16 %v623_v0 }
 0x1ea   :  { %484 = vmatpush.bf16.msrb.mxu2 %v853_v1 }
 0x1eb   :  { %506 = vmatpush.bf16.msrb.mxu3 %v853_v1  ;;  %v665_v1 = vld [vmem:[#allocation3 + $0x38] sm:$0xff]  }
 0x1ee   :  { %485 = vmatpush.bf16.msrb.mxu2 %v859_v2 }
 0x1ef   :  { %507 = vmatpush.bf16.msrb.mxu3 %v859_v2  ;;  %v624_v2 = vunpack.c.l.bf16 %v623_v0 }
 0x1f2   :  { %486 = vmatpush.bf16.msrb.mxu2 %v865_v3 }
 0x1f3   :  { %508 = vmatpush.bf16.msrb.mxu3 %v865_v3  ;;  %v628_v3 = vunpack.c.l.bf16 %v665_v1 }
 0x1f6   :  { %487 = vmatpush.bf16.msrb.mxu2 %v871_v4 }
 0x1f7   :  { %509 = vmatpush.bf16.msrb.mxu3 %v871_v4 }
 0x1fa   :  { %488 = vmatpush.bf16.msrb.mxu2 %v877_v5 }
 0x1fb   :  { %510 = vmatpush.bf16.msrb.mxu3 %v877_v5  ;;  %v629_v5 = vunpack.c.h.bf16 %v665_v1 }
 0x1fe   :  { %489 = vmatpush.bf16.msrb.mxu2 %v883_v6 }
 0x1ff   :  { %511 = vmatpush.bf16.msrb.mxu3 %v883_v6 }
 0x202   :  { %490 = vmatpush.bf16.msrb.mxu2 %v889_v7 }
 0x203   :  { %512 = vmatpush.bf16.msrb.mxu3 %v889_v7 }
 0x268   :  { %v284_v13 = vpop.f32.mrf.mxu2 }
 0x269   :  { %v294_v14 = vadd.f32 %v624_v2, %v284_v13  ;;  %v306_v15 = vpop.f32.mrf.mxu3  ;;  %v649_v13 = vunpack.c.h.bf16 %v647_v9 }
 0x26a   :  { %v315_v4 = vadd.f32 %v628_v3, %v306_v15 }
 0x26b   :  { %702 = vtanh.f32 %v294_v14  ;;  %v653_v14 = vunpack.c.h.bf16 %v668_v10 }
 0x26c   :  { %704 = vtanh.f32 %v315_v4 }
 0x270   :  { %v286_v17 = vpop.f32.mrf.mxu2 }
 0x271   :  { %v703_v18 = vpop.eup %702  ;;  %v295_v19 = vadd.f32 %v625_v16, %v286_v17  ;;  %v308_v6 = vpop.f32.mrf.mxu3 }
 0x272   :  { %v705_v20 = vpop.eup %704  ;;  %320 = vst [vmem:[#allocation8 + $0x60] sm:$0xff] %v703_v18  ;;  %v316_v21 = vadd.f32 %v629_v5, %v308_v6 }
 0x273   :  { %324 = vst [vmem:[#allocation8 + $0x70] sm:$0xff] %v705_v20  ;;  %706 = vtanh.f32 %v295_v19 }
 0x274   :  { %708 = vtanh.f32 %v316_v21 }
 0x279   :  { %v707_v7 = vpop.eup %706 }
 0x27a   :  { %v709_v22 = vpop.eup %708  ;;  %321 = vst [vmem:[#allocation8 + $0x68] sm:$0xff] %v707_v7  ;;  %v326_v23 = vpack.c.bf16 %v707_v7, %v703_v18  ;;  %v655_v7 = vld [vmem:[#allocation3 + $0x70] sm:$0xff]  }
 0x27b   :  { %325 = vst [vmem:[#allocation8 + $0x78] sm:$0xff] %v709_v22  ;;  %v348_v24 = vpack.c.bf16 %v709_v22, %v705_v20  ;;  %v669_v22 = vld [vmem:[#allocation3 + $0x78] sm:$0xff]  }
 0x27c   :  { %335 = vmatmul.bf16.vlgmr.msra.gmra.mxu0 %v326_v23  ;;  %v656_v23 = vunpack.c.l.bf16 %v655_v7 }
 0x27d   :  { %357 = vmatmul.bf16.vlgmr.msra.gmra.mxu1 %v348_v24  ;;  %v660_v24 = vunpack.c.l.bf16 %v669_v22 }
 0x2f9   :  { %v336_v29 = vpop.f32.mrf.mxu0 }
 0x2fa   :  { %v346_v30 = vadd.f32 %v632_v27, %v336_v29  ;;  %v358_v31 = vpop.f32.mrf.mxu1  ;;  %v657_v29 = vunpack.c.h.bf16 %v655_v7 }
 0x2fb   :  { %v367_v32 = vadd.f32 %v636_v28, %v358_v31 }
 0x2fc   :  { %710 = vtanh.f32 %v346_v30  ;;  %v661_v30 = vunpack.c.h.bf16 %v669_v22 }
 0x2fd   :  { %712 = vtanh.f32 %v367_v32 }
 0x301   :  { %v338_v35 = vpop.f32.mrf.mxu0 }
 0x302   :  { %v711_v36 = vpop.eup %710  ;;  %v347_v37 = vadd.f32 %v633_v33, %v338_v35  ;;  %v360_v38 = vpop.f32.mrf.mxu1 }
 0x303   :  { %v713_v39 = vpop.eup %712  ;;  %372 = vst [vmem:[#allocation8 + $0x80] sm:$0xff] %v711_v36  ;;  %v368_v40 = vadd.f32 %v637_v34, %v360_v38 }
 0x304   :  { %376 = vst [vmem:[#allocation8 + $0x90] sm:$0xff] %v713_v39  ;;  %714 = vtanh.f32 %v347_v37 }
 0x305   :  { %716 = vtanh.f32 %v368_v40 }
 0x30a   :  { %v715_v41 = vpop.eup %714 }
 0x30b   :  { %v717_v42 = vpop.eup %716  ;;  %373 = vst [vmem:[#allocation8 + $0x88] sm:$0xff] %v715_v41  ;;  %v378_v43 = vpack.c.bf16 %v715_v41, %v711_v36 }
 0x30c   :  { %377 = vst [vmem:[#allocation8 + $0x98] sm:$0xff] %v717_v42  ;;  %v400_v44 = vpack.c.bf16 %v717_v42, %v713_v39 }
 0x30d   :  { %387 = vmatmul.bf16.vlgmr.msra.gmra.mxu2 %v378_v43 }
 0x30e   :  { %409 = vmatmul.bf16.vlgmr.msra.gmra.mxu3 %v400_v44 }
 0x390   :  { %v388_v49 = vpop.f32.mrf.mxu2 }
 0x391   :  { %v398_v50 = vadd.f32 %v640_v47, %v388_v49  ;;  %v410_v51 = vpop.f32.mrf.mxu3 }
 0x392   :  { %v419_v52 = vadd.f32 %v644_v48, %v410_v51 }
 0x393   :  { %718 = vtanh.f32 %v398_v50 }
 0x394   :  { %720 = vtanh.f32 %v419_v52 }
 0x398   :  { %v390_v55 = vpop.f32.mrf.mxu2 }
 0x399   :  { %v719_v56 = vpop.eup %718  ;;  %v399_v57 = vadd.f32 %v641_v53, %v390_v55  ;;  %v412_v58 = vpop.f32.mrf.mxu3 }
 0x39a   :  { %v721_v59 = vpop.eup %720  ;;  %424 = vst [vmem:[#allocation8 + $0xa0] sm:$0xff] %v719_v56  ;;  %v420_v60 = vadd.f32 %v645_v54, %v412_v58 }
 0x39b   :  { %428 = vst [vmem:[#allocation8 + $0xb0] sm:$0xff] %v721_v59  ;;  %722 = vtanh.f32 %v399_v57 }
 0x39c   :  { %724 = vtanh.f32 %v420_v60 }
 0x3a1   :  { %v723_v61 = vpop.eup %722 }
 0x3a2   :  { %v725_v62 = vpop.eup %724  ;;  %425 = vst [vmem:[#allocation8 + $0xa8] sm:$0xff] %v723_v61  ;;  %v430_v63 = vpack.c.bf16 %v723_v61, %v719_v56 }
 0x3a3   :  { %429 = vst [vmem:[#allocation8 + $0xb8] sm:$0xff] %v725_v62  ;;  %v452_v8 = vpack.c.bf16 %v725_v62, %v721_v59 }
 0x3a4   :  { %439 = vmatmul.bf16.vlgmr.msrb.gmra.mxu0 %v430_v63 }
 0x3a5   :  { %461 = vmatmul.bf16.vlgmr.msrb.gmra.mxu1 %v452_v8 }
 0x421   :  { %v440_v0 = vpop.f32.mrf.mxu0 }
 0x422   :  { %v450_v1 = vadd.f32 %v648_v11, %v440_v0  ;;  %v462_v2 = vpop.f32.mrf.mxu1 }
 0x423   :  { %v471_v3 = vadd.f32 %v652_v12, %v462_v2 }
 0x424   :  { %726 = vtanh.f32 %v450_v1 }
 0x425   :  { %728 = vtanh.f32 %v471_v3 }
 0x429   :  { %v442_v15 = vpop.f32.mrf.mxu0 }
 0x42a   :  { %v727_v4 = vpop.eup %726  ;;  %v451_v16 = vadd.f32 %v649_v13, %v442_v15  ;;  %v464_v5 = vpop.f32.mrf.mxu1 }
 0x42b   :  { %v729_v17 = vpop.eup %728  ;;  %476 = vst [vmem:[#allocation8 + $0xc0] sm:$0xff] %v727_v4  ;;  %v472_v18 = vadd.f32 %v653_v14, %v464_v5 }
 0x42c   :  { %480 = vst [vmem:[#allocation8 + $0xd0] sm:$0xff] %v729_v17  ;;  %730 = vtanh.f32 %v451_v16 }
 0x42d   :  { %732 = vtanh.f32 %v472_v18 }
 0x432   :  { %v731_v19 = vpop.eup %730 }
 0x433   :  { %v733_v6 = vpop.eup %732  ;;  %477 = vst [vmem:[#allocation8 + $0xc8] sm:$0xff] %v731_v19  ;;  %v482_v20 = vpack.c.bf16 %v731_v19, %v727_v4 }
 0x434   :  { %481 = vst [vmem:[#allocation8 + $0xd8] sm:$0xff] %v733_v6  ;;  %v504_v21 = vpack.c.bf16 %v733_v6, %v729_v17 }
 0x435   :  { %491 = vmatmul.bf16.vlgmr.msrb.gmra.mxu2 %v482_v20 }
 0x436   :  { %513 = vmatmul.bf16.vlgmr.msrb.gmra.mxu3 %v504_v21 }
 0x4b8   :  { %v492_v25 = vpop.f32.mrf.mxu2 }
 0x4b9   :  { %v502_v26 = vadd.f32 %v656_v23, %v492_v25  ;;  %v514_v27 = vpop.f32.mrf.mxu3 }
 0x4ba   :  { %v523_v28 = vadd.f32 %v660_v24, %v514_v27 }
 0x4bb   :  { %734 = vtanh.f32 %v502_v26 }
 0x4bc   :  { %736 = vtanh.f32 %v523_v28 }
 0x4c0   :  { %v494_v31 = vpop.f32.mrf.mxu2 }
 0x4c1   :  { %v735_v32 = vpop.eup %734  ;;  %v503_v33 = vadd.f32 %v657_v29, %v494_v31  ;;  %v516_v34 = vpop.f32.mrf.mxu3 }
 0x4c2   :  { %v737_v35 = vpop.eup %736  ;;  %528 = vst [vmem:[#allocation8 + $0xe0] sm:$0xff] %v735_v32  ;;  %v524_v36 = vadd.f32 %v661_v30, %v516_v34 }
 0x4c3   :  { %532 = vst [vmem:[#allocation8 + $0xf0] sm:$0xff] %v737_v35  ;;  %738 = vtanh.f32 %v503_v33 }
 0x4c4   :  { %740 = vtanh.f32 %v524_v36 }
 0x4c9   :  { %v739_v37 = vpop.eup %738 }
 0x4ca   :  { %v741_v38 = vpop.eup %740  ;;  %529 = vst [vmem:[#allocation8 + $0xe8] sm:$0xff] %v739_v37 }
 0x4cb   :  { %533 = vst [vmem:[#allocation8 + $0xf8] sm:$0xff] %v741_v38 }
 0x4cc   :  { %550 = dma.vmem_to_hbm [thread:$0]  %s543_s1, 4096, %s545_s23, [#allocation5], %s826_s24, %s826_s24, %s827_s25  }
 0x4cd   :  { %818 = dma.done.wait [#allocation5], 4096  }
 0x4ce   :  { %819 = vsyncadd [#allocation5], 4294963200 }
 0x4cf   :  { %555 = vsyncpa [#allocation4], 1 }
 0x4d0   :  { %556 = vsyncpa [#allocation7], 1 }
 0x4d1   :  { %557 = vsyncpa [#allocation5], 1 }

</bundles_post_ra>
